<compile_context>
chip_gen: v7x
topology: tpu7x:2x2x1
jax: 0.10.0
libtpu: 0.0.40
codegen_flags: <defaults>
</compile_context>

<pallas_src>
import math
from functools import lru_cache

import numpy as np
import jax
import jax.numpy as jnp
from jax import lax
from jax.experimental import pallas as pl
from jax.experimental.pallas import tpu as pltpu


# ---------------------------------------------------------------------------
# small helpers
# ---------------------------------------------------------------------------
def _round_up(x, m):
    return ((x + m - 1) // m) * m


def _full_spec(shape):
    # single full-array VMEM block (block_shape == array dims is always legal)
    return pl.BlockSpec(shape, lambda i: (0,) * len(shape))


# ---------------------------------------------------------------------------
# Pallas kernels
# ---------------------------------------------------------------------------
@lru_cache(maxsize=None)
def _build_fused_score_scale_call(N_pad, E_pad, Cn, Ce):
    """Fused node/edge HodgeLaguerreConv(K=2, out=1) scoring + sigmoid +
    feature scaling + |B| score augmentation, as one pallas_call."""

    def kernel(Ln_ref, Le_ref, absB_ref, xn_ref, xe_ref,
               wn0_ref, wn1_ref, bn_ref, we0_ref, we1_ref, be_ref,
               xn_out, xe_out, aug_out):
        xn = xn_ref[...]                                    # (N_pad, Cn) f32
        xe = xe_ref[...]                                    # (E_pad, Ce) f32
        wn1 = wn1_ref[...]
        we1 = we1_ref[...]

        # v = x @ W1  -> (N, 1): cheap matvec against the features (f32)
        vn = jnp.dot(xn, wn1, preferred_element_type=jnp.float32)
        ve = jnp.dot(xe, we1, preferred_element_type=jnp.float32)

        # L @ v with bf16 operator stream, f32 accumulation
        lvn = jnp.dot(Ln_ref[...], vn.astype(jnp.bfloat16),
                      preferred_element_type=jnp.float32)
        lve = jnp.dot(Le_ref[...], ve.astype(jnp.bfloat16),
                      preferred_element_type=jnp.float32)

        # score = sigmoid(x@(W0+W1) - L@(x@W1) + b)   (== x@W0 + (x - Lx)@W1 + b)
        score_n = jax.nn.sigmoid(
            jnp.dot(xn, wn0_ref[...] + wn1, preferred_element_type=jnp.float32)
            - lvn + bn_ref[...])                            # (N_pad, 1) f32
        score_e = jax.nn.sigmoid(
            jnp.dot(xe, we0_ref[...] + we1, preferred_element_type=jnp.float32)
            - lve + be_ref[...])                            # (E_pad, 1) f32

        xn_out[...] = xn * score_n                          # x_n * score_n
        xe_out[...] = xe * score_e                          # x_e * score_e
        aug_out[...] = score_n + 0.125 * jnp.dot(           # score_n + 1/8 |B| score_e
            absB_ref[...], score_e.astype(jnp.bfloat16),
            preferred_element_type=jnp.float32)

    return pl.pallas_call(
        kernel,
        grid=(1,),
        in_specs=[_full_spec((N_pad, N_pad)),    # L_n  (bf16)
                  _full_spec((E_pad, E_pad)),    # L_e  (bf16)
                  _full_spec((N_pad, E_pad)),    # |B|  (bf16)
                  _full_spec((N_pad, Cn)),       # x_n  (f32)
                  _full_spec((E_pad, Ce)),       # x_e  (f32)
                  _full_spec((Cn, 1)), _full_spec((Cn, 1)), _full_spec((1, 1)),
                  _full_spec((Ce, 1)), _full_spec((Ce, 1)), _full_spec((1, 1))],
        out_specs=(_full_spec((N_pad, Cn)),
                   _full_spec((E_pad, Ce)),
                   _full_spec((N_pad, 1))),
        out_shape=(jax.ShapeDtypeStruct((N_pad, Cn), jnp.float32),
                   jax.ShapeDtypeStruct((E_pad, Ce), jnp.float32),
                   jax.ShapeDtypeStruct((N_pad, 1), jnp.float32)),
        compiler_params=pltpu.CompilerParams(
            dimension_semantics=("arbitrary",)),
    )


@lru_cache(maxsize=None)
def _build_pool_laplacian_call(N_pad, E_pad):
    """L0 = P P^T and L1 = P^T P from a single resident P tile (bf16 in, f32 out)."""

    def kernel(p_ref, l0_ref, l1_ref):
        p = p_ref[...]                                      # (N_pad, E_pad) bf16
        l0_ref[...] = lax.dot_general(                      # P @ P^T
            p, p, (((1,), (1,)), ((), ())),
            preferred_element_type=jnp.float32)
        l1_ref[...] = lax.dot_general(                      # P^T @ P
            p, p, (((0,), (0,)), ((), ())),
            preferred_element_type=jnp.float32)

    return pl.pallas_call(
        kernel,
        grid=(1,),
        in_specs=[_full_spec((N_pad, E_pad))],
        out_specs=(_full_spec((N_pad, N_pad)), _full_spec((E_pad, E_pad))),
        out_shape=(jax.ShapeDtypeStruct((N_pad, N_pad), jnp.float32),
                   jax.ShapeDtypeStruct((E_pad, E_pad), jnp.float32)),
        compiler_params=pltpu.CompilerParams(
            dimension_semantics=("arbitrary",)),
    )


# ---------------------------------------------------------------------------
# Glue helpers (plain numpy)
# ---------------------------------------------------------------------------
def dense_operator(edge_index, edge_weight, n):
    """Dense matrix so that propagate(edge_index, x, norm) == L @ x.
    PyG add-aggregation of norm[e]*x[src] at dst -> L[dst, src] += norm[e]."""
    L = np.zeros((n, n), dtype=np.float32)
    np.add.at(L, (edge_index[1], edge_index[0]), edge_weight)
    return L


def adj2par1_dense(edge_index, num_node, num_edge):
    """Dense node-edge incidence matrix: B[src,e] = -1, B[dst,e] = +1."""
    B = np.zeros((num_node, num_edge), dtype=np.float32)
    B[edge_index[0], np.arange(num_edge)] = -1.0
    B[edge_index[1], np.arange(num_edge)] = 1.0
    return B


def dense_to_sparse(M):
    rows, cols = np.nonzero(M)
    return (np.stack([rows, cols], axis=0).astype(np.int64),
            M[rows, cols].astype(np.float32))


def par2adj(P):
    rows, cols = np.nonzero(P)
    order = np.argsort(cols, kind="stable")
    return rows[order].reshape(-1, 2).T.astype(np.int64)


def glorot(key, shape):
    fan_in, fan_out = shape
    a = math.sqrt(6.0 / (fan_in + fan_out))
    return jax.random.uniform(key, shape, jnp.float32, -a, a)


# ---------------------------------------------------------------------------
# JointPooling_Node_Res forward (single-graph batch)
# ---------------------------------------------------------------------------
def joint_pooling_node_res_forward(params, x_n, edge_index_n, edge_weight_n,
                                   x_e, edge_index_e, edge_weight_e,
                                   edge_index, n_batch, e_batch, x_n0, x_e0,
                                   ratio=0.5):
    N, Cn = x_n.shape
    E, Ce = x_e.shape
    N_pad = _round_up(N, 8)
    E_pad = _round_up(E, 8)

    # --- host structural setup (depends on topology only; cacheable) ----------
    L_n = dense_operator(np.asarray(edge_index_n), np.asarray(edge_weight_n), N)
    L_e = dense_operator(np.asarray(edge_index_e), np.asarray(edge_weight_e), E)
    B = adj2par1_dense(np.asarray(edge_index), N, E)

    Ln_d = jnp.asarray(np.pad(L_n, ((0, N_pad - N), (0, N_pad - N))),
                       dtype=jnp.bfloat16)
    Le_d = jnp.asarray(np.pad(L_e, ((0, E_pad - E), (0, E_pad - E))),
                       dtype=jnp.bfloat16)
    absB_d = jnp.asarray(np.pad(np.abs(B), ((0, N_pad - N), (0, E_pad - E))),
                         dtype=jnp.bfloat16)
    xn_d = jnp.pad(jnp.asarray(x_n, jnp.float32), ((0, N_pad - N), (0, 0)))
    xe_d = jnp.pad(jnp.asarray(x_e, jnp.float32), ((0, E_pad - E), (0, 0)))

    # --- fused scoring / scaling / augmentation: ONE Pallas launch -------------
    fused = _build_fused_score_scale_call(N_pad, E_pad, Cn, Ce)
    xn_scaled, xe_scaled, score_aug = fused(
        Ln_d, Le_d, absB_d, xn_d, xe_d,
        params["wn0"], params["wn1"], params["bn"],
        params["we0"], params["we1"], params["be"])

    # --- the single mid-pipeline device->host sync: augmented node score -------
    aug = np.asarray(score_aug[:N, 0])

    # --- data-dependent graph surgery (host; dynamic shapes) -------------------
    perm = np.argsort(-aug, kind="stable")
    k_n = int(math.ceil(float(ratio) * N))
    mask_n = np.zeros(N, dtype=np.int64)
    mask_n[perm[:k_n]] = 1

    src = np.asarray(edge_index[0])
    dst = np.asarray(edge_index[1])
    # exact integer form of  |B|^T @ (1 - mask_n) == 0  : keep edge iff both ends kept
    keep_e = (mask_n[src] == 1) & (mask_n[dst] == 1)
    k_e = int(keep_e.sum())

    P = B[mask_n > 0][:, keep_e]                            # (k_n, k_e) in {-1,0,1}
    P_static = np.zeros((N_pad, E_pad), dtype=np.float32)   # static padded shape
    P_static[:k_n, :k_e] = P

    # --- pooled Laplacians L0 = P P^T, L1 = P^T P: ONE Pallas launch -----------
    pool = _build_pool_laplacian_call(N_pad, E_pad)
    L0_pad, L1_pad = pool(jnp.asarray(P_static, dtype=jnp.bfloat16))

    # device-side gathers of surviving features (no additional syncs here)
    idx_n = jnp.asarray(np.nonzero(mask_n)[0], dtype=jnp.int32)
    idx_e = jnp.asarray(np.nonzero(keep_e)[0], dtype=jnp.int32)
    new_x_n = jnp.take(xn_scaled, idx_n, axis=0)
    new_x_e = jnp.take(xe_scaled, idx_e, axis=0)
    x_n0_sel = jnp.take(jnp.asarray(x_n0, jnp.float32), idx_n, axis=0)
    x_e0_sel = jnp.take(jnp.asarray(x_e0, jnp.float32), idx_e, axis=0)

    # --- host sparse bookkeeping of the pooled Laplacians ----------------------
    L0 = np.asarray(L0_pad)[:k_n, :k_n]
    L1 = np.asarray(L1_pad)[:k_e, :k_e]
    edge_index_t, edge_weight_t = dense_to_sparse(L0)
    edge_index_s, edge_weight_s = dense_to_sparse(L1)

    # TODO(synk): scipy.sparse.linalg.eigsh('LM', k=1) has no Pallas equivalent;
    # full symmetric host eigensolve gives the same largest eigenvalue (PSD L0).
    max_lambda = float(np.linalg.eigvalsh(L0).max()) if L0.size else 1.0
    if max_lambda == 0.0:           # degenerate: no surviving edges
        max_lambda = 1.0
    edge_weight_t = 2.0 * edge_weight_t / max_lambda
    edge_weight_s = 2.0 * edge_weight_s / max_lambda

    new_n_batch = np.zeros(L0.shape[0], dtype=np.int64)
    new_e_batch = np.zeros(L1.shape[0], dtype=np.int64)
    new_par_edge_index = par2adj(P)

    outputs = [new_x_n, edge_index_t, edge_weight_t, new_n_batch,
               new_x_e, edge_index_s, edge_weight_s, new_e_batch,
               new_par_edge_index, x_n0_sel, x_e0_sel]
    return outputs, (xn_scaled, xe_scaled, score_aug)


# ---------------------------------------------------------------------------
# main
# ---------------------------------------------------------------------------
if __name__ == "__main__":
    N, E = 16, 24
    Cn, Ce = 4, 4
    ratio = 0.5

    # deterministic small graph: ring + chords
    edges = [(i, (i + 1) % N) for i in range(N)] + [(i, (i + 3) % N) for i in range(8)]
    edge_index = np.array(edges, dtype=np.int64).T                    # (2, E)

    # Hodge Laplacians used as the message-passing operators of the GNNs
    B_full = adj2par1_dense(edge_index, N, E)
    L0_full = B_full @ B_full.T
    L1_full = B_full.T @ B_full
    edge_index_n, edge_weight_n = dense_to_sparse(L0_full)
    edge_index_e, edge_weight_e = dense_to_sparse(L1_full)

    key = jax.random.PRNGKey(0)
    k1, k2, k3, k4, k5, k6, k7, k8 = jax.random.split(key, 8)
    x_n = jax.random.normal(k1, (N, Cn), jnp.float32)
    x_e = jax.random.normal(k2, (E, Ce), jnp.float32)
    x_n0 = jax.random.normal(k3, (N, Cn), jnp.float32)
    x_e0 = jax.random.normal(k4, (E, Ce), jnp.float32)
    n_batch = np.zeros(N, dtype=np.int64)
    e_batch = np.zeros(E, dtype=np.int64)

    # parameters: HodgeLaguerreConv(in, 1, K=2) -> two glorot linears + zero bias
    params = {
        "wn0": glorot(k5, (Cn, 1)), "wn1": glorot(k6, (Cn, 1)),
        "bn": jnp.zeros((1, 1), jnp.float32),
        "we0": glorot(k7, (Ce, 1)), "we1": glorot(k8, (Ce, 1)),
        "be": jnp.zeros((1, 1), jnp.float32),
    }

    outputs, intermediates = joint_pooling_node_res_forward(
        params, x_n, edge_index_n, edge_weight_n,
        x_e, edge_index_e, edge_weight_e,
        edge_index, n_batch, e_batch, x_n0, x_e0, ratio=ratio)

    for t in intermediates:
        jax.block_until_ready(t)
    for t in (outputs[0], outputs[4], outputs[9], outputs[10]):
        jax.block_until_ready(t)

    # light sanity checks on output structure
    assert outputs[0].shape[0] == int(math.ceil(ratio * N))
    assert outputs[4].shape[1] == Ce
    assert outputs[8].shape[0] == 2

    print("KERNEL_OK")
</pallas_src>

<mosaic_0001>
module attributes {stable_mosaic.version = 11 : i64} {
  func.func @kernel(%arg0: i32, %arg1: memref<16x16xbf16, #tpu.memory_space<vmem>>, %arg2: memref<24x24xbf16, #tpu.memory_space<vmem>>, %arg3: memref<16x24xbf16, #tpu.memory_space<vmem>>, %arg4: memref<16x4xf32, #tpu.memory_space<vmem>>, %arg5: memref<24x4xf32, #tpu.memory_space<vmem>>, %arg6: memref<4x1xf32, #tpu.memory_space<vmem>>, %arg7: memref<4x1xf32, #tpu.memory_space<vmem>>, %arg8: memref<1x1xf32, #tpu.memory_space<vmem>>, %arg9: memref<4x1xf32, #tpu.memory_space<vmem>>, %arg10: memref<4x1xf32, #tpu.memory_space<vmem>>, %arg11: memref<1x1xf32, #tpu.memory_space<vmem>>, %arg12: memref<16x4xf32, #tpu.memory_space<vmem>>, %arg13: memref<24x4xf32, #tpu.memory_space<vmem>>, %arg14: memref<16x1xf32, #tpu.memory_space<vmem>>) attributes {dimension_semantics = [#tpu.dimension_semantics<arbitrary>], iteration_bounds = array<i64: 1>, scalar_prefetch = 0 : i64, scratch_operands = 0 : i64, tpu.core_type = #tpu.core_type<tc>, window_params = [{pipeline_mode = #tpu.pipeline_mode<synchronous>, transform_indices = @transform_0, window_bounds = array<i64: 16, 16>}, {pipeline_mode = #tpu.pipeline_mode<synchronous>, transform_indices = @transform_1, window_bounds = array<i64: 24, 24>}, {pipeline_mode = #tpu.pipeline_mode<synchronous>, transform_indices = @transform_2, window_bounds = array<i64: 16, 24>}, {pipeline_mode = #tpu.pipeline_mode<synchronous>, transform_indices = @transform_3, window_bounds = array<i64: 16, 4>}, {pipeline_mode = #tpu.pipeline_mode<synchronous>, transform_indices = @transform_4, window_bounds = array<i64: 24, 4>}, {pipeline_mode = #tpu.pipeline_mode<synchronous>, transform_indices = @transform_5, window_bounds = array<i64: 4, 1>}, {pipeline_mode = #tpu.pipeline_mode<synchronous>, transform_indices = @transform_6, window_bounds = array<i64: 4, 1>}, {pipeline_mode = #tpu.pipeline_mode<synchronous>, transform_indices = @transform_7, window_bounds = array<i64: 1, 1>}, {pipeline_mode = #tpu.pipeline_mode<synchronous>, transform_indices = @transform_8, window_bounds = array<i64: 4, 1>}, {pipeline_mode = #tpu.pipeline_mode<synchronous>, transform_indices = @transform_9, window_bounds = array<i64: 4, 1>}, {pipeline_mode = #tpu.pipeline_mode<synchronous>, transform_indices = @transform_10, window_bounds = array<i64: 1, 1>}, {pipeline_mode = #tpu.pipeline_mode<synchronous>, transform_indices = @transform_11, window_bounds = array<i64: 16, 4>}, {pipeline_mode = #tpu.pipeline_mode<synchronous>, transform_indices = @transform_12, window_bounds = array<i64: 24, 4>}, {pipeline_mode = #tpu.pipeline_mode<synchronous>, transform_indices = @transform_13, window_bounds = array<i64: 16, 1>}]} {
    %c0 = arith.constant 0 : index
    %c0_0 = arith.constant 0 : index
    %0 = vector.load %arg4[%c0, %c0_0] : memref<16x4xf32, #tpu.memory_space<vmem>>, vector<16x4xf32>
    %c0_1 = arith.constant 0 : index
    %c0_2 = arith.constant 0 : index
    %1 = vector.load %arg5[%c0_1, %c0_2] : memref<24x4xf32, #tpu.memory_space<vmem>>, vector<24x4xf32>
    %c0_3 = arith.constant 0 : index
    %c0_4 = arith.constant 0 : index
    %2 = vector.load %arg7[%c0_3, %c0_4] : memref<4x1xf32, #tpu.memory_space<vmem>>, vector<4x1xf32>
    %c0_5 = arith.constant 0 : index
    %c0_6 = arith.constant 0 : index
    %3 = vector.load %arg10[%c0_5, %c0_6] : memref<4x1xf32, #tpu.memory_space<vmem>>, vector<4x1xf32>
    %cst = arith.constant dense<0.000000e+00> : vector<16x1xf32>
    %4 = tpu.matmul %0, %2, %cst {dimension_numbers = #tpu.dot_dimension_numbers<[1], [0], [0], [1], [0, 0, 1, 1], [], []>} : vector<16x4xf32>, vector<4x1xf32>, vector<16x1xf32> -> vector<16x1xf32>
    %cst_7 = arith.constant dense<0.000000e+00> : vector<24x1xf32>
    %5 = tpu.matmul %1, %3, %cst_7 {dimension_numbers = #tpu.dot_dimension_numbers<[1], [0], [0], [1], [0, 0, 1, 1], [], []>} : vector<24x4xf32>, vector<4x1xf32>, vector<24x1xf32> -> vector<24x1xf32>
    %c0_8 = arith.constant 0 : index
    %c0_9 = arith.constant 0 : index
    %6 = vector.load %arg1[%c0_8, %c0_9] : memref<16x16xbf16, #tpu.memory_space<vmem>>, vector<16x16xbf16>
    %7 = arith.truncf %4 : vector<16x1xf32> to vector<16x1xbf16>
    %cst_10 = arith.constant dense<0.000000e+00> : vector<16x1xf32>
    %8 = tpu.matmul %6, %7, %cst_10 {dimension_numbers = #tpu.dot_dimension_numbers<[1], [0], [0], [1], [0, 0, 1, 1], [], []>} : vector<16x16xbf16>, vector<16x1xbf16>, vector<16x1xf32> -> vector<16x1xf32>
    %c0_11 = arith.constant 0 : index
    %c0_12 = arith.constant 0 : index
    %9 = vector.load %arg2[%c0_11, %c0_12] : memref<24x24xbf16, #tpu.memory_space<vmem>>, vector<24x24xbf16>
    %10 = arith.truncf %5 : vector<24x1xf32> to vector<24x1xbf16>
    %cst_13 = arith.constant dense<0.000000e+00> : vector<24x1xf32>
    %11 = tpu.matmul %9, %10, %cst_13 {dimension_numbers = #tpu.dot_dimension_numbers<[1], [0], [0], [1], [0, 0, 1, 1], [], []>} : vector<24x24xbf16>, vector<24x1xbf16>, vector<24x1xf32> -> vector<24x1xf32>
    %c0_14 = arith.constant 0 : index
    %c0_15 = arith.constant 0 : index
    %12 = vector.load %arg6[%c0_14, %c0_15] : memref<4x1xf32, #tpu.memory_space<vmem>>, vector<4x1xf32>
    %13 = arith.addf %12, %2 : vector<4x1xf32>
    %cst_16 = arith.constant dense<0.000000e+00> : vector<16x1xf32>
    %14 = tpu.matmul %0, %13, %cst_16 {dimension_numbers = #tpu.dot_dimension_numbers<[1], [0], [0], [1], [0, 0, 1, 1], [], []>} : vector<16x4xf32>, vector<4x1xf32>, vector<16x1xf32> -> vector<16x1xf32>
    %15 = arith.subf %14, %8 : vector<16x1xf32>
    %c0_17 = arith.constant 0 : index
    %c0_18 = arith.constant 0 : index
    %16 = vector.load %arg8[%c0_17, %c0_18] : memref<1x1xf32, #tpu.memory_space<vmem>>, vector<1x1xf32>
    %17 = vector.broadcast %16 : vector<1x1xf32> to vector<16x1xf32>
    %18 = arith.addf %15, %17 : vector<16x1xf32>
    %19 = arith.negf %18 : vector<16x1xf32>
    %20 = math.exp %19 : vector<16x1xf32>
    %cst_19 = arith.constant 1.000000e+00 : f32
    %21 = vector.broadcast %cst_19 : f32 to vector<16x1xf32>
    %22 = arith.addf %21, %20 : vector<16x1xf32>
    %23 = arith.divf %21, %22 : vector<16x1xf32>
    %c0_20 = arith.constant 0 : index
    %c0_21 = arith.constant 0 : index
    %24 = vector.load %arg9[%c0_20, %c0_21] : memref<4x1xf32, #tpu.memory_space<vmem>>, vector<4x1xf32>
    %25 = arith.addf %24, %3 : vector<4x1xf32>
    %cst_22 = arith.constant dense<0.000000e+00> : vector<24x1xf32>
    %26 = tpu.matmul %1, %25, %cst_22 {dimension_numbers = #tpu.dot_dimension_numbers<[1], [0], [0], [1], [0, 0, 1, 1], [], []>} : vector<24x4xf32>, vector<4x1xf32>, vector<24x1xf32> -> vector<24x1xf32>
    %27 = arith.subf %26, %11 : vector<24x1xf32>
    %c0_23 = arith.constant 0 : index
    %c0_24 = arith.constant 0 : index
    %28 = vector.load %arg11[%c0_23, %c0_24] : memref<1x1xf32, #tpu.memory_space<vmem>>, vector<1x1xf32>
    %29 = vector.broadcast %28 : vector<1x1xf32> to vector<24x1xf32>
    %30 = arith.addf %27, %29 : vector<24x1xf32>
    %31 = arith.negf %30 : vector<24x1xf32>
    %32 = math.exp %31 : vector<24x1xf32>
    %cst_25 = arith.constant 1.000000e+00 : f32
    %33 = vector.broadcast %cst_25 : f32 to vector<24x1xf32>
    %34 = arith.addf %33, %32 : vector<24x1xf32>
    %35 = arith.divf %33, %34 : vector<24x1xf32>
    %36 = vector.broadcast %23 : vector<16x1xf32> to vector<16x4xf32>
    %37 = arith.mulf %0, %36 : vector<16x4xf32>
    %c0_26 = arith.constant 0 : index
    %c0_27 = arith.constant 0 : index
    %38 = vector.load %arg12[%c0_26, %c0_27] : memref<16x4xf32, #tpu.memory_space<vmem>>, vector<16x4xf32>
    tpu.vector_store %arg12[%c0_26, %c0_27], %37 {strides = array<i32>} : memref<16x4xf32, #tpu.memory_space<vmem>>, vector<16x4xf32>,
    %39 = vector.broadcast %35 : vector<24x1xf32> to vector<24x4xf32>
    %40 = arith.mulf %1, %39 : vector<24x4xf32>
    %c0_28 = arith.constant 0 : index
    %c0_29 = arith.constant 0 : index
    %41 = vector.load %arg13[%c0_28, %c0_29] : memref<24x4xf32, #tpu.memory_space<vmem>>, vector<24x4xf32>
    tpu.vector_store %arg13[%c0_28, %c0_29], %40 {strides = array<i32>} : memref<24x4xf32, #tpu.memory_space<vmem>>, vector<24x4xf32>,
    %c0_30 = arith.constant 0 : index
    %c0_31 = arith.constant 0 : index
    %42 = vector.load %arg3[%c0_30, %c0_31] : memref<16x24xbf16, #tpu.memory_space<vmem>>, vector<16x24xbf16>
    %43 = arith.truncf %35 : vector<24x1xf32> to vector<24x1xbf16>
    %cst_32 = arith.constant dense<0.000000e+00> : vector<16x1xf32>
    %44 = tpu.matmul %42, %43, %cst_32 {dimension_numbers = #tpu.dot_dimension_numbers<[1], [0], [0], [1], [0, 0, 1, 1], [], []>} : vector<16x24xbf16>, vector<24x1xbf16>, vector<16x1xf32> -> vector<16x1xf32>
    %cst_33 = arith.constant 1.250000e-01 : f32
    %45 = vector.broadcast %cst_33 : f32 to vector<16x1xf32>
    %46 = arith.mulf %45, %44 : vector<16x1xf32>
    %47 = arith.addf %23, %46 : vector<16x1xf32>
    %c0_34 = arith.constant 0 : index
    %c0_35 = arith.constant 0 : index
    %48 = vector.load %arg14[%c0_34, %c0_35] : memref<16x1xf32, #tpu.memory_space<vmem>>, vector<16x1xf32>
    tpu.vector_store %arg14[%c0_34, %c0_35], %47 {strides = array<i32>} : memref<16x1xf32, #tpu.memory_space<vmem>>, vector<16x1xf32>,
    return
  }
  func.func @transform_0(%arg0: i32) -> (i32, i32) {
    %c0_i32 = arith.constant 0 : i32
    %c0_i32_0 = arith.constant 0 : i32
    %c0_i32_1 = arith.constant 0 : i32
    return %c0_i32, %c0_i32_0 : i32, i32
  }
  func.func @transform_1(%arg0: i32) -> (i32, i32) {
    %c0_i32 = arith.constant 0 : i32
    %c0_i32_0 = arith.constant 0 : i32
    %c0_i32_1 = arith.constant 0 : i32
    return %c0_i32, %c0_i32_0 : i32, i32
  }
  func.func @transform_2(%arg0: i32) -> (i32, i32) {
    %c0_i32 = arith.constant 0 : i32
    %c0_i32_0 = arith.constant 0 : i32
    %c0_i32_1 = arith.constant 0 : i32
    return %c0_i32, %c0_i32_0 : i32, i32
  }
  func.func @transform_3(%arg0: i32) -> (i32, i32) {
    %c0_i32 = arith.constant 0 : i32
    %c0_i32_0 = arith.constant 0 : i32
    %c0_i32_1 = arith.constant 0 : i32
    return %c0_i32, %c0_i32_0 : i32, i32
  }
  func.func @transform_4(%arg0: i32) -> (i32, i32) {
    %c0_i32 = arith.constant 0 : i32
    %c0_i32_0 = arith.constant 0 : i32
    %c0_i32_1 = arith.constant 0 : i32
    return %c0_i32, %c0_i32_0 : i32, i32
  }
  func.func @transform_5(%arg0: i32) -> (i32, i32) {
    %c0_i32 = arith.constant 0 : i32
    %c0_i32_0 = arith.constant 0 : i32
    %c0_i32_1 = arith.constant 0 : i32
    return %c0_i32, %c0_i32_0 : i32, i32
  }
  func.func @transform_6(%arg0: i32) -> (i32, i32) {
    %c0_i32 = arith.constant 0 : i32
    %c0_i32_0 = arith.constant 0 : i32
    %c0_i32_1 = arith.constant 0 : i32
    return %c0_i32, %c0_i32_0 : i32, i32
  }
  func.func @transform_7(%arg0: i32) -> (i32, i32) {
    %c0_i32 = arith.constant 0 : i32
    %c0_i32_0 = arith.constant 0 : i32
    %c0_i32_1 = arith.constant 0 : i32
    return %c0_i32, %c0_i32_0 : i32, i32
  }
  func.func @transform_8(%arg0: i32) -> (i32, i32) {
    %c0_i32 = arith.constant 0 : i32
    %c0_i32_0 = arith.constant 0 : i32
    %c0_i32_1 = arith.constant 0 : i32
    return %c0_i32, %c0_i32_0 : i32, i32
  }
  func.func @transform_9(%arg0: i32) -> (i32, i32) {
    %c0_i32 = arith.constant 0 : i32
    %c0_i32_0 = arith.constant 0 : i32
    %c0_i32_1 = arith.constant 0 : i32
    return %c0_i32, %c0_i32_0 : i32, i32
  }
  func.func @transform_10(%arg0: i32) -> (i32, i32) {
    %c0_i32 = arith.constant 0 : i32
    %c0_i32_0 = arith.constant 0 : i32
    %c0_i32_1 = arith.constant 0 : i32
    return %c0_i32, %c0_i32_0 : i32, i32
  }
  func.func @transform_11(%arg0: i32) -> (i32, i32) {
    %c0_i32 = arith.constant 0 : i32
    %c0_i32_0 = arith.constant 0 : i32
    %c0_i32_1 = arith.constant 0 : i32
    return %c0_i32, %c0_i32_0 : i32, i32
  }
  func.func @transform_12(%arg0: i32) -> (i32, i32) {
    %c0_i32 = arith.constant 0 : i32
    %c0_i32_0 = arith.constant 0 : i32
    %c0_i32_1 = arith.constant 0 : i32
    return %c0_i32, %c0_i32_0 : i32, i32
  }
  func.func @transform_13(%arg0: i32) -> (i32, i32) {
    %c0_i32 = arith.constant 0 : i32
    %c0_i32_0 = arith.constant 0 : i32
    %c0_i32_1 = arith.constant 0 : i32
    return %c0_i32, %c0_i32_0 : i32, i32
  }
}

</mosaic_0001>

<bundles_post_ra>
// kernel: tpu_custom_call.1
= control target key start
LH: loop header
LB: loop body
LE: loop exit
PB: predicated region body
PF: predicated region fallthrough
CT: control target
= control target key end

     0   :  { %vm60_vm0 = vcmask 1043456   ;;  %vm53_vm1 = vcmask 31744   ;;  %v820_v0 = vmov 0.0   ;;  %vm821_vm2 = vmmov 0   ;;  %s1032_s5 = inlined_call_operand.vmem [shape: f32[4,1], index: 5, kind: input, shape index: {}]   ;;  %s1033_s6 = inlined_call_operand.vmem [shape: f32[4,1], index: 6, kind: input, shape index: {}]   ;;  %s1034_s9 = inlined_call_operand.vmem [shape: f32[4,1], index: 9, kind: input, shape index: {}]   ;;  %s1035_s3 = inlined_call_operand.vmem [shape: f32[16,4], index: 3, kind: input, shape index: {}]   ;;  %s1036_s4 = inlined_call_operand.vmem [shape: f32[24,4], index: 4, kind: input, shape index: {}]   ;;  %s1037_s8 = inlined_call_operand.vmem [shape: f32[4,1], index: 8, kind: input, shape index: {}]   ;;  %s1038_s0 = inlined_call_operand.vmem [shape: bf16[16,16], index: 0, kind: input, shape index: {}]   ;;  %s1039_s1 = inlined_call_operand.vmem [shape: bf16[24,24], index: 1, kind: input, shape index: {}]   ;;  %s1040_s7 = inlined_call_operand.<no memory space> [shape: f32[1,1], index: 7, kind: input, shape index: {}]   ;;  %s1041_s10 = inlined_call_operand.<no memory space> [shape: f32[1,1], index: 10, kind: input, shape index: {}]   ;;  %s1042_s2 = inlined_call_operand.vmem [shape: bf16[16,24], index: 2, kind: input, shape index: {}]   ;;  %s1043_s11 = inlined_call_operand.vmem [shape: f32[16,4], index: 11, kind: output, shape index: {0}]   ;;  %s1044_s12 = inlined_call_operand.vmem [shape: f32[24,4], index: 12, kind: output, shape index: {1}]   ;;  %s1045_s13 = inlined_call_operand.vmem [shape: f32[16,1], index: 13, kind: output, shape index: {2}]  }
   0x1   :  { %741 = vmatprep.subr.mxu1 %v820_v0  ;;  %v51_v1 = vld [vmem:[%s1033_s6] sm:$0xf]  ;;  %743 = vmatprep.mubr.msk.f32.mxu1 %vm821_vm2, %v820_v0  ;;  %v923_v7 = vld [vmem:[%s1035_s3 + $0x8] sm:$0xff]  ;;  %v949_v9 = vld [vmem:[%s1036_s4 + $0x10] sm:$0xff]  ;;  %vm239_vm3 = vcmask 130048   ;;  %vm297_vm4 = vcmask 195584   ;;  %v19_v28 = vstv %s1040_s7 }
   0x2   :  { %v355_v2 = vld [vmem:[%s1032_s5] sm:$0xf]  ;;  %736 = vmatprep.subr.msk.mxu0 %vm60_vm0, %v51_v1  ;;  %v934_v8 = vld [vmem:[%s1036_s4 + $0x8] sm:$0xff]  ;;  %20 = vst [vmem:[#allocation2] sm:$0x1] %v19_v28  ;;  %v21_v30 = vstv %s1041_s10  ;;  %v822_v37 = vmov 0  }
   0x3   :  { %v52_v3 = vld [vmem:[%s1034_s9] sm:$0xf]  ;;  %v356_v4 = vadd.f32 %v355_v2, %v51_v1  ;;  %737 = vmatpush3.msk.msra.mxu0 %vm60_vm0, %v51_v1  ;;  %v798_v26 = vld [vmem:[%s1039_s1 + $0x8] ss:$0 sps:$4 sm:$0xff]   ;;  %22 = vst [vmem:[#allocation3] sm:$0x1] %v21_v30  ;;  %794 = vset.pattern.permute.xlu0 %v822_v37 }
   0x4   :  { %742 = vmatpush3.msk.msra.mxu1 %vm60_vm0, %v52_v3  ;;  %v910_v5 = vld [vmem:[%s1035_s3] sm:$0xff]  ;;  %752 = vmatprep.subr.bf16.mxu0 %v820_v0  ;;  %vm669_vm5 = vcmask 7168  }
   0x5   :  { %v915_v6 = vld [vmem:[%s1036_s4] sm:$0xff]  ;;  %738 = vmatprep.mubr.msk.f32.mxu0 %vm53_vm1, %v910_v5  ;;  %766 = vmatprep.subr.msk.mxu1 %vm60_vm0, %v356_v4 }
   0x6   :  { %744 = vmatmul.mubr.msk.f32.vlgmr.msra.gmra.mrb[0].mxu1 %vm53_vm1, %v915_v6  ;;  %739 = vmatmul.mubr.msk.f32.vlgmr.msra.gmra.mrb[0].mxu0 %vm53_vm1, %v923_v7  ;;  %v458_v10 = vld [vmem:[%s1037_s8] sm:$0xf] }
   0x7   :  { %746 = vmatprep.mubr.msk.f32.mxu1 %vm821_vm2, %v820_v0  ;;  %767 = vmatpush3.msk.msra.mxu1 %vm60_vm0, %v356_v4  ;;  %v459_v11 = vadd.f32 %v458_v10, %v52_v3  ;;  %v796_v17 = vld [vmem:[%s1038_s0] sm:$0xff]  }
   0x8   :  { %771 = vmatprep.subr.mxu1 %v820_v0  ;;  %754 = vmatprep.mubr.msk.bf16.mxu0 %vm821_vm2, %v820_v0  ;;  %v797_v19 = vld [vmem:[%s1039_s1] sm:$0xff]  }
   0x9   :  { %795 = vset.pattern.permute.xlu1 %v822_v37  ;;  %v700_v39 = vld [vmem:[#allocation2] ss:$0 sm:$0xff] }
   0xa   :  { %747 = vmatmul.mubr.msk.f32.gmra.mrb[2].mxu1 %vm53_vm1, %v934_v8  ;;  %v707_v50 = vld [vmem:[#allocation3] ss:$0 sm:$0xff] }
   0xb   :  { %749 = vmatprep.mubr.msk.f32.mxu1 %vm821_vm2, %v820_v0 }
   0xe   :  { %750 = vmatmul.mubr.msk.f32.gmra.mrb[4].mxu1 %vm53_vm1, %v949_v9 }
   0xf   :  { %768 = vmatprep.mubr.msk.f32.mxu1 %vm53_vm1, %v910_v5 }
  0x12   :  { %769 = vmatmul.mubr.msk.f32.vlgmr.msra.gmra.mrb[6].mxu1 %vm53_vm1, %v923_v7 }
  0x13   :  { %772 = vmatpush3.msk.msra.mxu1 %vm60_vm0, %v459_v11  ;;  %773 = vmatprep.mubr.msk.f32.mxu1 %vm821_vm2, %v820_v0 }
  0x16   :  { %774 = vmatmul.mubr.msk.f32.vlgmr.msra.gmra.mrb[8].mxu1 %vm53_vm1, %v915_v6 }
  0x17   :  { %776 = vmatprep.mubr.msk.f32.mxu1 %vm821_vm2, %v820_v0 }
  0x1a   :  { %777 = vmatmul.mubr.msk.f32.gmra.mrb[10].mxu1 %vm53_vm1, %v934_v8 }
  0x1b   :  { %779 = vmatprep.mubr.msk.f32.mxu1 %vm821_vm2, %v820_v0 }
  0x1e   :  { %780 = vmatmul.mubr.msk.f32.gmra.mrb[12].mxu1 %vm53_vm1, %v949_v9 }
  0xd9   :  { %v217_v12 = vpop.f32.mrb[0].mxu1  ;;  %v740_v13 = vpop.f32.mrb[0].mxu0 }
  0xda   :  { %v745_v14 = vpop.f32.mrb[1].mxu1  ;;  %v130_v15 = vpop.f32.mrb[1].mxu0 }
  0xdb   :  { %v233_v16 = vpack.c.bf16 %v740_v13, %v130_v15 }
  0xdd   :  { %v222_v18 = vpop.f32.mrb[2].mxu1  ;;  %753 = vmatpush3.bf16.msra.mxu0 %v233_v16 }
  0xde   :  { %v287_v20 = vpack.c.bf16 %v222_v18, %v217_v12  ;;  %v748_v21 = vpop.f32.mrb[3].mxu1 }
  0xe0   :  { %758 = vmatprep.subr.bf16.mxu0 %v287_v20  ;;  %755 = vmatmul.mubr.msk.bf16.vlgmr.msra.gmra.mrb[4].mxu0 %vm239_vm3, %v796_v17 }
  0xe1   :  { %v227_v22 = vpop.f32.mrb[4].mxu1  ;;  %759 = vmatpush3.bf16.msra.mxu0 %v287_v20  ;;  %762 = vmatprep.mubr.msk.bf16.mxu0 %vm297_vm4, %v797_v19 }
  0xe2   :  { %v288_v23 = vpack.c.bf16 %v227_v22, %v227_v22  ;;  %v751_v24 = vpop.f32.mrb[5].mxu1 }
  0xe4   :  { %v305_v25 = vsel %vm60_vm0, %v288_v23, 0  ;;  %790 = vmatprep.subr.msk.bf16.mxu0 %vm60_vm0, %v288_v23  ;;  %v799_v23 = vld [vmem:[%s1042_s2] sm:$0xff]  }
  0xe5   :  { %761 = vmatpush3.bf16.msra.mxu0 %v305_v25  ;;  %v770_v27 = vpop.f32.mrb[6].mxu1 }
  0xe6   :  { %782 = vmatprep.subr.bf16.mxu0 %v820_v0  ;;  %v426_v29 = vpop.f32.mrb[7].mxu1 }
  0xe8   :  { %763 = vmatmul.mubr.msk.bf16.vlgmr.msra.gmra.mrb[8].mxu0 %vm297_vm4, %v798_v26 }
  0xe9   :  { %786 = vmatprep.mubr.msk.bf16.mxu0 %vm821_vm2, %v820_v0  ;;  %v529_v31 = vpop.f32.mrb[8].mxu1 }
  0xea   :  { %v775_v32 = vpop.f32.mrb[9].mxu1 }
  0xed   :  { %v534_v33 = vpop.f32.mrb[10].mxu1 }
  0xee   :  { %v778_v34 = vpop.f32.mrb[11].mxu1 }
  0xf1   :  { %v539_v35 = vpop.f32.mrb[12].mxu1 }
  0xf2   :  { %v781_v36 = vpop.f32.mrb[13].mxu1 }
 0x1b3   :  { %v277_v38 = vpop.f32.mrb[4].mxu0 }
 0x1b4   :  { %v435_v40 = vsub.f32 %v426_v29, %v277_v38  ;;  %v756_v41 = vpop.f32.mrb[5].mxu0 }
 0x1b5   :  { %v280_v42 = vpop.f32.mrb[6].mxu0 }
 0x1b6   :  { %v444_v43 = vadd.f32 %v700_v39, %v435_v40  ;;  %v436_v44 = vsub.f32 %v770_v27, %v280_v42  ;;  %v757_v45 = vpop.f32.mrb[7].mxu0 }
 0x1b8   :  { %v701_v46 = vmul.f32 -1.442695, %v444_v43  ;;  %v445_v47 = vadd.f32 %v700_v39, %v436_v44 }
 0x1ba   :  { %800 = vpow2.f32 %v701_v46  ;;  %v702_v48 = vmul.f32 -1.442695, %v445_v47 }
 0x1bb   :  { %v764_v49 = vpop.f32.mrb[8].mxu0 }
 0x1bc   :  { %802 = vpow2.f32 %v702_v48  ;;  %v545_v51 = vsub.f32 %v539_v35, %v764_v49  ;;  %v341_v52 = vpop.f32.mrb[9].mxu0 }
 0x1bd   :  { %v543_v53 = vsub.f32 %v529_v31, %v341_v52  ;;  %v765_v54 = vpop.f32.mrb[10].mxu0 }
 0x1be   :  { %v555_v55 = vadd.f32 %v707_v50, %v545_v51  ;;  %v344_v56 = vpop.f32.mrb[11].mxu0 }
 0x1bf   :  { %v553_v57 = vadd.f32 %v707_v50, %v543_v53  ;;  %v544_v58 = vsub.f32 %v534_v33, %v344_v56 }
 0x1c0   :  { %v710_v59 = vmul.f32 -1.442695, %v555_v55 }
 0x1c1   :  { %v708_v60 = vmul.f32 -1.442695, %v553_v57  ;;  %v554_v61 = vadd.f32 %v707_v50, %v544_v58 }
 0x1c2   :  { %804 = vpow2.f32 %v710_v59 }
 0x1c3   :  { %806 = vpow2.f32 %v708_v60  ;;  %v709_v62 = vmul.f32 -1.442695, %v554_v61 }
 0x1c4   :  { %v801_v63 = vpop.eup %800 }
 0x1c5   :  { %v452_v1 = vadd.f32 1.0, %v801_v63  ;;  %808 = vpow2.f32 %v709_v62 }
 0x1c6   :  { %v803_v2 = vpop.eup %802 }
 0x1c7   :  { %810 = vrcp.f32 %v452_v1  ;;  %v453_v3 = vadd.f32 1.0, %v803_v2 }
 0x1c9   :  { %812 = vrcp.f32 %v453_v3 }
 0x1cc   :  { %v805_v4 = vpop.eup %804 }
 0x1cd   :  { %v807_v10 = vpop.eup %806  ;;  %v567_v11 = vadd.f32 1.0, %v805_v4 }
 0x1ce   :  { %v565_v12 = vadd.f32 1.0, %v807_v10 }
 0x1cf   :  { %v809_v13 = vpop.eup %808  ;;  %814 = vrcp.f32 %v567_v11 }
 0x1d0   :  { %816 = vrcp.f32 %v565_v12  ;;  %v566_v14 = vadd.f32 1.0, %v809_v13 }
 0x1d1   :  { %v811_v15 = vpop.eup %810 }
 0x1d2   :  { %818 = vrcp.f32 %v566_v14  ;;  %576 = vperm.xlu0 %794, %v811_v15  }
 0x1d3   :  { %v813_v16 = vpop.eup %812 }
 0x1d6   :  { %581 = vperm.xlu0 %794, %v813_v16  }
 0x1d9   :  { %v815_v17 = vpop.eup %814 }
 0x1da   :  { %v817_v18 = vpop.eup %816  ;;  %600 = vperm.xlu0 %794, %v815_v17   ;;  %v612_v21 = vpack.c.bf16 %v815_v17, %v815_v17 }
 0x1db   :  { %590 = vperm.xlu1 %795, %v817_v18  }
 0x1dc   :  { %v819_v19 = vpop.eup %818  ;;  %v622_v22 = vsel %vm60_vm0, %v612_v21, 0 }
 0x1dd   :  { %v611_v20 = vpack.c.bf16 %v819_v19, %v817_v18 }
 0x1df   :  { %595 = vperm.xlu1 %795, %v819_v19   ;;  %783 = vmatpush3.bf16.msra.mxu0 %v611_v20 }
 0x1e0   :  { %784 = vmatprep.subr.bf16.mxu0 %v820_v0 }
 0x1e3   :  { %785 = vmatpush3.bf16.msra.mxu0 %v622_v22 }
 0x1e6   :  { %787 = vmatmul.mubr.msk.bf16.vlgmr.msra.gmra.mrb[12].mxu0 %vm297_vm4, %v799_v23 }
 0x251   :  { %v577_v24 = vpop.permute.xlu0 %576 }
 0x252   :  { %v584_v25 = vmul.f32 %v577_v24, %v910_v5 }
 0x254   :  { %586 = vst.msk [vmem:[%s1043_s11] sm:$0xff] %vm53_vm1, %v584_v25 }
 0x255   :  { %v582_v26 = vpop.permute.xlu0 %581 }
 0x256   :  { %v585_v0 = vmul.f32 %v582_v26, %v923_v7 }
 0x258   :  { %587 = vst.msk [vmem:[%s1043_s11 + $0x8] sm:$0xff] %vm53_vm1, %v585_v0 }
 0x259   :  { %v601_v27 = vpop.permute.xlu0 %600 }
 0x25a   :  { %v605_v28 = vmul.f32 %v601_v27, %v949_v9  ;;  %v591_v29 = vpop.permute.xlu1 %590 }
 0x25b   :  { %v603_v30 = vmul.f32 %v591_v29, %v915_v6 }
 0x25c   :  { %608 = vst.msk [vmem:[%s1044_s12 + $0x10] sm:$0xff] %vm53_vm1, %v605_v28 }
 0x25d   :  { %606 = vst.msk [vmem:[%s1044_s12] sm:$0xff] %vm53_vm1, %v603_v30 }
 0x25e   :  { %v596_v5 = vpop.permute.xlu1 %595 }
 0x25f   :  { %v604_v7 = vmul.f32 %v596_v5, %v934_v8 }
 0x261   :  { %607 = vst.msk [vmem:[%s1044_s12 + $0x8] sm:$0xff] %vm53_vm1, %v604_v7 }
 0x2b9   :  { %v658_v9 = vpop.f32.mrb[12].mxu0 }
 0x2ba   :  { %v665_v6 = vmul.f32 0.125, %v658_v9  ;;  %v788_v31 = vpop.f32.mrb[13].mxu0 }
 0x2bb   :  { %v661_v32 = vpop.f32.mrb[14].mxu0 }
 0x2bc   :  { %v667_v33 = vadd.f32 %v811_v15, %v665_v6  ;;  %v666_v34 = vmul.f32 0.125, %v661_v32  ;;  %v789_v35 = vpop.f32.mrb[15].mxu0 }
 0x2be   :  { %670 = vst.msk [vmem:[%s1045_s13] sm:$0xff] %vm669_vm5, %v667_v33  ;;  %v668_v36 = vadd.f32 %v813_v16, %v666_v34 }
 0x2c0   :  { %671 = vst.msk [vmem:[%s1045_s13 + $0x8] sm:$0xff] %vm669_vm5, %v668_v36 }

</bundles_post_ra>
